<compile_context>
chip_gen: v7x
topology: tpu7x:2x2x1
jax: 0.10.0
libtpu: 0.0.40
codegen_flags: <defaults>
</compile_context>

<pallas_src>
import jax
import jax.numpy as jnp
from jax.experimental import pallas as pl
from jax.experimental.pallas import tpu as pltpu

H1_PAD = 128  # 76  -> 128 lanes
H2_PAD = 128  # 38  -> 128 lanes


def _round_up(x, m):
    return ((x + m - 1) // m) * m


def dqn_c2s_kernel(x_ref, w1_ref, b1_ref, w2_ref, b2_ref, w3_ref, b3_ref, o_ref):
    # fc1 + tanh  (bf16 MXU operands, f32 accumulate, f32 bias/tanh)
    x = x_ref[...].astype(jnp.bfloat16)
    h1 = jnp.tanh(
        jnp.dot(x, w1_ref[...], preferred_element_type=jnp.float32) + b1_ref[...]
    )
    # fc2 + tanh
    h2 = jnp.tanh(
        jnp.dot(h1.astype(jnp.bfloat16), w2_ref[...],
                preferred_element_type=jnp.float32) + b2_ref[...]
    )
    # fc3 (no activation)
    out = (
        jnp.dot(h2.astype(jnp.bfloat16), w3_ref[...],
                preferred_element_type=jnp.float32) + b3_ref[...]
    )
    o_ref[...] = out.astype(o_ref.dtype)


def dqn_c2s_forward(x, params, out_dim, *, batch_tile=512):
    """x: [batch, input_dim] float32. params: padded bf16 weights / f32 biases."""
    w1, b1 = params["w1"], params["b1"]
    w2, b2 = params["w2"], params["b2"]
    w3, b3 = params["w3"], params["b3"]
    batch, input_dim = x.shape
    out_pad = w3.shape[1]

    # Large batch tiles amortize per-step overhead; tiny batches just round up
    # to a sublane multiple (8).
    tb = batch_tile if batch >= batch_tile else _round_up(batch, 8)
    padded_batch = _round_up(batch, tb)
    if padded_batch != batch:
        x = jnp.pad(x, ((0, padded_batch - batch), (0, 0)))

    grid = (padded_batch // tb,)

    x_spec = pl.BlockSpec((tb, input_dim), lambda i: (i, 0))
    out_spec = pl.BlockSpec((tb, out_pad), lambda i: (i, 0))

    def const_spec(shape):
        # Constant block index -> weights/biases stay resident across grid steps.
        return pl.BlockSpec(shape, lambda i: (0, 0))

    out_padded = pl.pallas_call(
        dqn_c2s_kernel,
        out_shape=jax.ShapeDtypeStruct((padded_batch, out_pad), jnp.float32),
        grid=grid,
        in_specs=[
            x_spec,
            const_spec(w1.shape), const_spec(b1.shape),
            const_spec(w2.shape), const_spec(b2.shape),
            const_spec(w3.shape), const_spec(b3.shape),
        ],
        out_specs=out_spec,
        compiler_params=pltpu.CompilerParams(
            dimension_semantics=("parallel",),  # shard batch across v7x's 2 TCs
        ),
    )(x, w1, b1, w2, b2, w3, b3)

    return out_padded[:batch, :out_dim]


def init_params(key, input_dim, output_dim):
    """nn.Linear-style U(-1/sqrt(fan_in), 1/sqrt(fan_in)) init.

    Weights are stored transposed vs. PyTorch ([in, out]) and zero-padded to
    lane-dense widths; weights are bf16 (MXU operands), biases stay f32.
    """
    out_pad = _round_up(output_dim, 128)
    layer_dims = [
        # (fan_in, fan_out, padded_in, padded_out)
        (input_dim, 76, input_dim, H1_PAD),
        (76, 38, H1_PAD, H2_PAD),
        (38, output_dim, H2_PAD, out_pad),
    ]
    params = {}
    keys = jax.random.split(key, 2 * len(layer_dims))
    for i, (fan_in, fan_out, in_pad, fo_pad) in enumerate(layer_dims):
        bound = float(fan_in) ** -0.5
        w = jax.random.uniform(
            keys[2 * i], (fan_in, fan_out), jnp.float32, -bound, bound
        )
        b = jax.random.uniform(
            keys[2 * i + 1], (1, fan_out), jnp.float32, -bound, bound
        )
        # Zero padding: padded bias lanes are 0 and padded weight cols are 0, so
        # padded hidden lanes stay exactly tanh(0) = 0 and never contaminate
        # the next layer.
        w_pad = jnp.zeros((in_pad, fo_pad), jnp.float32).at[:fan_in, :fan_out].set(w)
        b_pad = jnp.zeros((1, fo_pad), jnp.float32).at[:, :fan_out].set(b)
        params[f"w{i+1}"] = w_pad.astype(jnp.bfloat16)
        params[f"b{i+1}"] = b_pad
    return params


def reference_forward(x, params, out_dim):
    """Pure-JAX f32 reference (bf16 weights upcast to f32)."""
    w1 = params["w1"].astype(jnp.float32)
    w2 = params["w2"].astype(jnp.float32)
    w3 = params["w3"].astype(jnp.float32)
    h1 = jnp.tanh(x @ w1 + params["b1"])
    h2 = jnp.tanh(h1 @ w2 + params["b2"])
    out = h2 @ w3 + params["b3"]
    return out[:, :out_dim]


if __name__ == "__main__":
    key = jax.random.PRNGKey(0)
    kx, kp = jax.random.split(key)

    batch, input_dim, output_dim = 8, 16, 4
    x = jax.random.normal(kx, (batch, input_dim), jnp.float32)
    params = init_params(kp, input_dim, output_dim)

    out = dqn_c2s_forward(x, params, output_dim)
    out = jax.block_until_ready(out)

    ref = reference_forward(x, params, output_dim)
    assert out.shape == (batch, output_dim)
    # bf16 MXU operands -> slightly looser tolerance than pure f32.
    assert jnp.allclose(out, ref, atol=5e-2, rtol=5e-2), "mismatch vs reference"

    print("KERNEL_OK")
</pallas_src>

<mosaic_0001>
module attributes {stable_mosaic.version = 11 : i64} {
  func.func @dqn_c2s_kernel(%arg0: i32, %arg1: memref<8x16xf32, #tpu.memory_space<vmem>>, %arg2: memref<16x128xbf16, #tpu.memory_space<vmem>>, %arg3: memref<1x128xf32, #tpu.memory_space<vmem>>, %arg4: memref<128x128xbf16, #tpu.memory_space<vmem>>, %arg5: memref<1x128xf32, #tpu.memory_space<vmem>>, %arg6: memref<128x128xbf16, #tpu.memory_space<vmem>>, %arg7: memref<1x128xf32, #tpu.memory_space<vmem>>, %arg8: memref<8x128xf32, #tpu.memory_space<vmem>>) attributes {dimension_semantics = [#tpu.dimension_semantics<parallel>], iteration_bounds = array<i64: 1>, scalar_prefetch = 0 : i64, scratch_operands = 0 : i64, tpu.core_type = #tpu.core_type<tc>, window_params = [{transform_indices = @transform_0, window_bounds = array<i64: 8, 16>}, {pipeline_mode = #tpu.pipeline_mode<synchronous>, transform_indices = @transform_1, window_bounds = array<i64: 16, 128>}, {pipeline_mode = #tpu.pipeline_mode<synchronous>, transform_indices = @transform_2, window_bounds = array<i64: 1, 128>}, {pipeline_mode = #tpu.pipeline_mode<synchronous>, transform_indices = @transform_3, window_bounds = array<i64: 128, 128>}, {pipeline_mode = #tpu.pipeline_mode<synchronous>, transform_indices = @transform_4, window_bounds = array<i64: 1, 128>}, {pipeline_mode = #tpu.pipeline_mode<synchronous>, transform_indices = @transform_5, window_bounds = array<i64: 128, 128>}, {pipeline_mode = #tpu.pipeline_mode<synchronous>, transform_indices = @transform_6, window_bounds = array<i64: 1, 128>}, {transform_indices = @transform_7, window_bounds = array<i64: 8, 128>}]} {
    %c0 = arith.constant 0 : index
    %c0_0 = arith.constant 0 : index
    %0 = vector.load %arg1[%c0, %c0_0] : memref<8x16xf32, #tpu.memory_space<vmem>>, vector<8x16xf32>
    %1 = arith.truncf %0 : vector<8x16xf32> to vector<8x16xbf16>
    %c0_1 = arith.constant 0 : index
    %c0_2 = arith.constant 0 : index
    %2 = vector.load %arg2[%c0_1, %c0_2] : memref<16x128xbf16, #tpu.memory_space<vmem>>, vector<16x128xbf16>
    %cst = arith.constant dense<0.000000e+00> : vector<8x128xf32>
    %3 = tpu.matmul %1, %2, %cst {dimension_numbers = #tpu.dot_dimension_numbers<[1], [0], [0], [1], [0, 0, 1, 1], [], []>} : vector<8x16xbf16>, vector<16x128xbf16>, vector<8x128xf32> -> vector<8x128xf32>
    %c0_3 = arith.constant 0 : index
    %c0_4 = arith.constant 0 : index
    %4 = vector.load %arg3[%c0_3, %c0_4] : memref<1x128xf32, #tpu.memory_space<vmem>>, vector<1x128xf32>
    %5 = vector.broadcast %4 : vector<1x128xf32> to vector<8x128xf32>
    %6 = arith.addf %3, %5 : vector<8x128xf32>
    %7 = math.tanh %6 : vector<8x128xf32>
    %8 = arith.truncf %7 : vector<8x128xf32> to vector<8x128xbf16>
    %c0_5 = arith.constant 0 : index
    %c0_6 = arith.constant 0 : index
    %9 = vector.load %arg4[%c0_5, %c0_6] : memref<128x128xbf16, #tpu.memory_space<vmem>>, vector<128x128xbf16>
    %cst_7 = arith.constant dense<0.000000e+00> : vector<8x128xf32>
    %10 = tpu.matmul %8, %9, %cst_7 {dimension_numbers = #tpu.dot_dimension_numbers<[1], [0], [0], [1], [0, 0, 1, 1], [], []>} : vector<8x128xbf16>, vector<128x128xbf16>, vector<8x128xf32> -> vector<8x128xf32>
    %c0_8 = arith.constant 0 : index
    %c0_9 = arith.constant 0 : index
    %11 = vector.load %arg5[%c0_8, %c0_9] : memref<1x128xf32, #tpu.memory_space<vmem>>, vector<1x128xf32>
    %12 = vector.broadcast %11 : vector<1x128xf32> to vector<8x128xf32>
    %13 = arith.addf %10, %12 : vector<8x128xf32>
    %14 = math.tanh %13 : vector<8x128xf32>
    %15 = arith.truncf %14 : vector<8x128xf32> to vector<8x128xbf16>
    %c0_10 = arith.constant 0 : index
    %c0_11 = arith.constant 0 : index
    %16 = vector.load %arg6[%c0_10, %c0_11] : memref<128x128xbf16, #tpu.memory_space<vmem>>, vector<128x128xbf16>
    %cst_12 = arith.constant dense<0.000000e+00> : vector<8x128xf32>
    %17 = tpu.matmul %15, %16, %cst_12 {dimension_numbers = #tpu.dot_dimension_numbers<[1], [0], [0], [1], [0, 0, 1, 1], [], []>} : vector<8x128xbf16>, vector<128x128xbf16>, vector<8x128xf32> -> vector<8x128xf32>
    %c0_13 = arith.constant 0 : index
    %c0_14 = arith.constant 0 : index
    %18 = vector.load %arg7[%c0_13, %c0_14] : memref<1x128xf32, #tpu.memory_space<vmem>>, vector<1x128xf32>
    %19 = vector.broadcast %18 : vector<1x128xf32> to vector<8x128xf32>
    %20 = arith.addf %17, %19 : vector<8x128xf32>
    %c0_15 = arith.constant 0 : index
    %c0_16 = arith.constant 0 : index
    %21 = vector.load %arg8[%c0_15, %c0_16] : memref<8x128xf32, #tpu.memory_space<vmem>>, vector<8x128xf32>
    tpu.vector_store %arg8[%c0_15, %c0_16], %20 {strides = array<i32>} : memref<8x128xf32, #tpu.memory_space<vmem>>, vector<8x128xf32>,
    return
  }
  func.func @transform_0(%arg0: i32) -> (i32, i32) {
    %c0_i32 = arith.constant 0 : i32
    %c0_i32_0 = arith.constant 0 : i32
    return %arg0, %c0_i32 : i32, i32
  }
  func.func @transform_1(%arg0: i32) -> (i32, i32) {
    %c0_i32 = arith.constant 0 : i32
    %c0_i32_0 = arith.constant 0 : i32
    %c0_i32_1 = arith.constant 0 : i32
    return %c0_i32, %c0_i32_0 : i32, i32
  }
  func.func @transform_2(%arg0: i32) -> (i32, i32) {
    %c0_i32 = arith.constant 0 : i32
    %c0_i32_0 = arith.constant 0 : i32
    %c0_i32_1 = arith.constant 0 : i32
    return %c0_i32, %c0_i32_0 : i32, i32
  }
  func.func @transform_3(%arg0: i32) -> (i32, i32) {
    %c0_i32 = arith.constant 0 : i32
    %c0_i32_0 = arith.constant 0 : i32
    %c0_i32_1 = arith.constant 0 : i32
    return %c0_i32, %c0_i32_0 : i32, i32
  }
  func.func @transform_4(%arg0: i32) -> (i32, i32) {
    %c0_i32 = arith.constant 0 : i32
    %c0_i32_0 = arith.constant 0 : i32
    %c0_i32_1 = arith.constant 0 : i32
    return %c0_i32, %c0_i32_0 : i32, i32
  }
  func.func @transform_5(%arg0: i32) -> (i32, i32) {
    %c0_i32 = arith.constant 0 : i32
    %c0_i32_0 = arith.constant 0 : i32
    %c0_i32_1 = arith.constant 0 : i32
    return %c0_i32, %c0_i32_0 : i32, i32
  }
  func.func @transform_6(%arg0: i32) -> (i32, i32) {
    %c0_i32 = arith.constant 0 : i32
    %c0_i32_0 = arith.constant 0 : i32
    %c0_i32_1 = arith.constant 0 : i32
    return %c0_i32, %c0_i32_0 : i32, i32
  }
  func.func @transform_7(%arg0: i32) -> (i32, i32) {
    %c0_i32 = arith.constant 0 : i32
    %c0_i32_0 = arith.constant 0 : i32
    return %arg0, %c0_i32 : i32, i32
  }
}

</mosaic_0001>

<bundles_post_ra>
// kernel: tpu_custom_call.1
= control target key start
LH: loop header
LB: loop body
LE: loop exit
PB: predicated region body
PF: predicated region fallthrough
CT: control target
= control target key end

     0   :  { %12 = vsyncpa [#allocation3], 0  ;;  %s771_s0 = inlined_call_operand.hbm [shape: f32[8,16], index: 0, kind: input, shape index: {}]   ;;  %s772_s1 = inlined_call_operand.hbm [shape: bf16[16,128], index: 1, kind: input, shape index: {}]   ;;  %s773_s2 = inlined_call_operand.vmem [shape: f32[1,128], index: 2, kind: input, shape index: {}]   ;;  %s774_s3 = inlined_call_operand.hbm [shape: bf16[128,128], index: 3, kind: input, shape index: {}]   ;;  %s775_s4 = inlined_call_operand.vmem [shape: f32[1,128], index: 4, kind: input, shape index: {}]   ;;  %s776_s5 = inlined_call_operand.hbm [shape: bf16[128,128], index: 5, kind: input, shape index: {}]   ;;  %s777_s6 = inlined_call_operand.vmem [shape: f32[1,128], index: 6, kind: input, shape index: {}]   ;;  %s778_s7 = inlined_call_operand.hbm [shape: f32[8,128], index: 7, kind: output, shape index: {}]  }
   0x1   :  { %13 = vsyncpa [#allocation6], 0 }
   0x2   :  { %14 = vsyncpa [#allocation9], 0 }
   0x3   :  { %15 = vsyncpa [#allocation4], 0  ;;  %s621_s24 = smov [#allocation5]   ;;  %s503_s28 = scalar_lea.hbm %s772_s1, 128 }
   0x4   :  { %s31_s25 = sshll.u32 %s621_s24, 4  ;;  %p504_p0 = scmp.ne.s32.totalorder %s772_s1, %s503_s28  ;;  %s32_s25 = int_to_ptr.vmem [resolvable:$true] %s31_s25 }
   0x5   :  { %p507_p1 = scmp.lt.u32.totalorder %s503_s28, %s772_s1 }
   0x7   :  { %p509_p2 = pnand %p507_p1, %p504_p0 }
   0x9   :  { %512 = shalt.err (!%p509_p2)
}
   0xa   :  { %s513_s10 = scalar_lea.vmem %s32_s25, 128  ;;  %p518_p4 = scmp.lt.s32.totalorder %s32_s25, %s32_s25 }
   0xb   :  { %p514_p3 = scmp.ne.s32.totalorder %s32_s25, %s513_s10  ;;  %p519_p5 = scmp.lt.s32.totalorder %s513_s10, %s513_s10 }
   0xd   :  { %p520_p6 = por %p519_p5, %p518_p4 }
   0xf   :  { %p521_p7 = pnand %p520_p6, %p514_p3 }
  0x11   :  { %524 = shalt.err (!%p521_p7)
}
  0x12   :  { %s622_s11 = smov 64   ;;  %s623_s12 = smov 4  }
  0x13   :  { %37 = dma.hbm_to_vmem [thread:$0]  %s772_s1, 128, %s32_s25, [#allocation6], %s622_s11, %s622_s11, %s623_s12  }
  0x14   :  { %s624_s15 = smov [#allocation2]   ;;  %s625_s17 = smov [#allocation7]  }
  0x15   :  { %s22_s16 = sshll.u32 %s624_s15, 4  ;;  %s45_s18 = sshll.u32 %s625_s17, 4  ;;  %s23_s16 = int_to_ptr.vmem [resolvable:$true] %s22_s16  ;;  %s46_s18 = int_to_ptr.vmem [resolvable:$true] %s45_s18 }
  0x16   :  { %s525_s21 = scalar_lea.hbm %s771_s0, 128 }
  0x17   :  { %p526_p8 = scmp.ne.s32.totalorder %s771_s0, %s525_s21  ;;  %p529_p9 = scmp.lt.u32.totalorder %s525_s21, %s771_s0 }
  0x19   :  { %p531_p10 = pnand %p529_p9, %p526_p8 }
  0x1b   :  { %534 = shalt.err (!%p531_p10)
}
  0x1c   :  { %s535_s1 = scalar_lea.vmem %s23_s16, 128  ;;  %p540_p12 = scmp.lt.s32.totalorder %s23_s16, %s23_s16 }
  0x1d   :  { %p536_p11 = scmp.ne.s32.totalorder %s23_s16, %s535_s1  ;;  %p541_p13 = scmp.lt.s32.totalorder %s535_s1, %s535_s1 }
  0x1f   :  { %p542_p0 = por %p541_p13, %p540_p12 }
  0x21   :  { %p543_p1 = pnand %p542_p0, %p536_p11 }
  0x23   :  { %546 = shalt.err (!%p543_p1)
}
  0x24   :  { %25 = dma.hbm_to_vmem [thread:$0]  %s771_s0, 128, %s23_s16, [#allocation3]  }
  0x25   :  { %s547_s30 = scalar_lea.hbm %s774_s3, 1024 }
  0x26   :  { %p548_p2 = scmp.ne.s32.totalorder %s774_s3, %s547_s30  ;;  %p551_p3 = scmp.lt.u32.totalorder %s547_s30, %s774_s3 }
  0x28   :  { %p553_p4 = pnand %p551_p3, %p548_p2 }
  0x2a   :  { %556 = shalt.err (!%p553_p4)
}
  0x2b   :  { %s557_s14 = scalar_lea.vmem %s46_s18, 1024  ;;  %p562_p6 = scmp.lt.s32.totalorder %s46_s18, %s46_s18 }
  0x2c   :  { %p558_p5 = scmp.ne.s32.totalorder %s46_s18, %s557_s14  ;;  %p563_p7 = scmp.lt.s32.totalorder %s557_s14, %s557_s14 }
  0x2e   :  { %p564_p8 = por %p563_p7, %p562_p6 }
  0x30   :  { %p565_p9 = pnand %p564_p8, %p558_p5 }
  0x32   :  { %568 = shalt.err (!%p565_p9)
}
  0x33   :  { %51 = dma.hbm_to_vmem [thread:$0]  %s774_s3, 1024, %s46_s18, [#allocation6], %s622_s11, %s622_s11, %s623_s12  }
  0x34   :  { %s626_s16 = smov [#allocation8]   ;;  %s569_s21 = scalar_lea.hbm %s776_s5, 1024 }
  0x35   :  { %s59_s17 = sshll.u32 %s626_s16, 4  ;;  %p570_p10 = scmp.ne.s32.totalorder %s776_s5, %s569_s21  ;;  %s60_s17 = int_to_ptr.vmem [resolvable:$true] %s59_s17 }
  0x36   :  { %p573_p11 = scmp.lt.u32.totalorder %s569_s21, %s776_s5 }
  0x38   :  { %p575_p12 = pnand %p573_p11, %p570_p10 }
  0x3a   :  { %578 = shalt.err (!%p575_p12)
}
  0x3b   :  { %s579_s1 = scalar_lea.vmem %s60_s17, 1024  ;;  %p584_p0 = scmp.lt.s32.totalorder %s60_s17, %s60_s17 }
  0x3c   :  { %p580_p13 = scmp.ne.s32.totalorder %s60_s17, %s579_s1  ;;  %p585_p1 = scmp.lt.s32.totalorder %s579_s1, %s579_s1 }
  0x3e   :  { %p586_p2 = por %p585_p1, %p584_p0 }
  0x40   :  { %p587_p3 = pnand %p586_p2, %p580_p13 }
  0x42   :  { %590 = shalt.err (!%p587_p3)
}
  0x43   :  { %65 = dma.hbm_to_vmem [thread:$0]  %s776_s5, 1024, %s60_s17, [#allocation9], %s622_s11, %s622_s11, %s623_s12  }
  0x44   :  { %613 = dma.done.wait [#allocation3], 128  }
  0x45   :  { %614 = vsyncadd [#allocation3], 4294967168 }
  0x46   :  { %615 = dma.done.wait [#allocation6], 1152  }
  0x47   :  { %616 = vsyncadd [#allocation6], 4294966144 }
  0x48   :  { %617 = dma.done.wait [#allocation9], 1024  }
  0x49   :  { %618 = vsyncadd [#allocation9], 4294966272  ;;  %v627_v0 = vmov 0.0   ;;  %vm628_vm0 = vmmov 0   ;;  %v482_v1 = vld [vmem:[#allocation5] sm:$0xff]   ;;  %v81_v2 = vld [vmem:[#allocation2] sm:$0xff] }
  0x4a   :  { %427 = vmatprep.subr.bf16.mxu0 %v627_v0  ;;  %429 = vmatprep.mubr.msk.bf16.mxu0 %vm628_vm0, %v627_v0  ;;  %v82_v3 = vpack.c.bf16 %v81_v2, %v81_v2  ;;  %vm98_vm1 = vcmask 130048   ;;  %v483_v4 = vld [vmem:[#allocation7] sm:$0xff]   ;;  %v484_v5 = vld [vmem:[#allocation7 + $0x8] sm:$0xff]   ;;  %v485_v6 = vld [vmem:[#allocation7 + $0x10] sm:$0xff]   ;;  %s629_s28 = smov [#allocation10]  }
  0x4b   :  { %433 = vmatprep.subr.bf16.mxu1 %v627_v0  ;;  %449 = vmatprep.mubr.msk.bf16.mxu1 %vm628_vm0, %v627_v0  ;;  %v486_v7 = vld [vmem:[#allocation7 + $0x18] sm:$0xff]   ;;  %v487_v8 = vld [vmem:[#allocation7 + $0x20] sm:$0xff]   ;;  %v488_v9 = vld [vmem:[#allocation7 + $0x28] sm:$0xff]   ;;  %s375_s29 = sshll.u32 %s629_s28, 4  ;;  %s376_s29 = int_to_ptr.vmem [resolvable:$true] %s375_s29 }
  0x4c   :  { %428 = vmatpush3.bf16.msra.mxu0 %v482_v1  ;;  %434 = vmatpush3.bf16.msra.mxu1 %v483_v4  ;;  %v489_v10 = vld [vmem:[#allocation7 + $0x30] sm:$0xff]   ;;  %v490_v11 = vld [vmem:[#allocation7 + $0x38] sm:$0xff]   ;;  %v491_v12 = vld [vmem:[#allocation8] sm:$0xff]   ;;  %p596_p5 = scmp.lt.s32.totalorder %s376_s29, %s376_s29 }
  0x4d   :  { %453 = vmatprep.subr.bf16.mxu0 %v627_v0  ;;  %435 = vmatprep.subr.bf16.mxu1 %v627_v0  ;;  %v492_v13 = vld [vmem:[#allocation8 + $0x8] sm:$0xff]   ;;  %v493_v14 = vld [vmem:[#allocation8 + $0x10] sm:$0xff]   ;;  %v494_v15 = vld [vmem:[#allocation8 + $0x18] sm:$0xff]  }
  0x4e   :  { %v386_v16 = vld [vmem:[%s773_s2] ss:$0 sm:$0xff]  ;;  %v495_v24 = vld [vmem:[#allocation8 + $0x20] sm:$0xff]   ;;  %v496_v25 = vld [vmem:[#allocation8 + $0x28] sm:$0xff]  }
  0x4f   :  { %430 = vmatmul.mubr.msk.bf16.vlgmr.msra.gmra.mrb[0].mxu0 %vm98_vm1, %v82_v3  ;;  %v497_v26 = vld [vmem:[#allocation8 + $0x30] sm:$0xff]   ;;  %v498_v27 = vld [vmem:[#allocation8 + $0x38] sm:$0xff]  }
  0x50   :  { %469 = vmatprep.mubr.msk.bf16.mxu0 %vm628_vm0, %v627_v0  ;;  %436 = vmatpush3.bf16.msra.mxu1 %v484_v5  ;;  %v389_v28 = vld [vmem:[%s775_s4] ss:$0 sm:$0xff]  ;;  %s591_s4 = scalar_lea.vmem %s376_s29, 128 }
  0x51   :  { %437 = vmatprep.subr.bf16.mxu1 %v627_v0  ;;  %454 = vmatpush3.bf16.msra.mxu0 %v491_v12  ;;  %v398_v36 = vld [vmem:[%s777_s6] ss:$0 sm:$0xff]  ;;  %p592_p4 = scmp.ne.s32.totalorder %s376_s29, %s591_s4  ;;  %p597_p6 = scmp.lt.s32.totalorder %s591_s4, %s591_s4 }
  0x52   :  { %455 = vmatprep.subr.bf16.mxu0 %v627_v0 }
  0x53   :  { %p598_p7 = por %p597_p6, %p596_p5 }
  0x54   :  { %438 = vmatpush3.bf16.msra.mxu1 %v485_v6 }
  0x55   :  { %439 = vmatprep.subr.bf16.mxu1 %v627_v0  ;;  %456 = vmatpush3.bf16.msra.mxu0 %v492_v13  ;;  %p599_p8 = pnand %p598_p7, %p592_p4 }
  0x56   :  { %457 = vmatprep.subr.bf16.mxu0 %v627_v0 }
  0x58   :  { %440 = vmatpush3.bf16.msra.mxu1 %v486_v7 }
  0x59   :  { %441 = vmatprep.subr.bf16.mxu1 %v627_v0  ;;  %458 = vmatpush3.bf16.msra.mxu0 %v493_v14 }
  0x5a   :  { %459 = vmatprep.subr.bf16.mxu0 %v627_v0 }
  0x5c   :  { %442 = vmatpush3.bf16.msra.mxu1 %v487_v8 }
  0x5d   :  { %443 = vmatprep.subr.bf16.mxu1 %v627_v0  ;;  %460 = vmatpush3.bf16.msra.mxu0 %v494_v15 }
  0x5e   :  { %461 = vmatprep.subr.bf16.mxu0 %v627_v0 }
  0x60   :  { %444 = vmatpush3.bf16.msra.mxu1 %v488_v9 }
  0x61   :  { %445 = vmatprep.subr.bf16.mxu1 %v627_v0  ;;  %462 = vmatpush3.bf16.msra.mxu0 %v495_v24 }
  0x62   :  { %463 = vmatprep.subr.bf16.mxu0 %v627_v0 }
  0x64   :  { %446 = vmatpush3.bf16.msra.mxu1 %v489_v10 }
  0x65   :  { %447 = vmatprep.subr.bf16.mxu1 %v627_v0  ;;  %464 = vmatpush3.bf16.msra.mxu0 %v496_v25 }
  0x66   :  { %465 = vmatprep.subr.bf16.mxu0 %v627_v0 }
  0x68   :  { %448 = vmatpush3.bf16.msra.mxu1 %v490_v11 }
  0x69   :  { %466 = vmatpush3.bf16.msra.mxu0 %v497_v26 }
  0x6a   :  { %467 = vmatprep.subr.bf16.mxu0 %v627_v0 }
  0x6d   :  { %468 = vmatpush3.bf16.msra.mxu0 %v498_v27 }
 0x122   :  { %v136_v17 = vpop.f32.mrb[0].mxu0 }
 0x123   :  { %v137_v18 = vadd.f32 %v386_v16, %v136_v17  ;;  %v431_v19 = vpop.f32.mrb[1].mxu0 }
 0x124   :  { %v139_v20 = vpop.f32.mrb[2].mxu0 }
 0x125   :  { %499 = vtanh.f32 %v137_v18  ;;  %v432_v21 = vpop.f32.mrb[3].mxu0 }
 0x12f   :  { %v500_v22 = vpop.eup %499 }
 0x130   :  { %v143_v23 = vpack.c.bf16 %v500_v22, %v500_v22 }
 0x132   :  { %450 = vmatmul.mubr.bf16.vlgmr.msra.gmra.mrb[0].mxu1 %v143_v23 }
 0x205   :  { %v249_v29 = vpop.f32.mrb[0].mxu1 }
 0x206   :  { %v250_v30 = vadd.f32 %v389_v28, %v249_v29  ;;  %v451_v31 = vpop.f32.mrb[1].mxu1 }
 0x207   :  { %v252_v32 = vpop.f32.mrb[2].mxu1 }
 0x208   :  { %501 = vtanh.f32 %v250_v30  ;;  %v452_v33 = vpop.f32.mrb[3].mxu1 }
 0x212   :  { %v502_v34 = vpop.eup %501 }
 0x213   :  { %v256_v35 = vpack.c.bf16 %v502_v34, %v502_v34 }
 0x215   :  { %470 = vmatmul.mubr.bf16.vlgmr.msra.gmra.mrb[4].mxu0 %v256_v35 }
 0x2e8   :  { %v362_v37 = vpop.f32.mrb[4].mxu0 }
 0x2e9   :  { %v363_v38 = vadd.f32 %v398_v36, %v362_v37  ;;  %v471_v39 = vpop.f32.mrb[5].mxu0 }
 0x2ea   :  { %v365_v40 = vpop.f32.mrb[6].mxu0 }
 0x2eb   :  { %368 = vst [vmem:[#allocation10] sm:$0xff] %v363_v38  ;;  %v472_v41 = vpop.f32.mrb[7].mxu0 }
 0x2ec   :  { %602 = shalt.err (!%p599_p8)
}
 0x2ed   :  { %s603_s6 = scalar_lea.hbm %s778_s7, 128 }
 0x2ee   :  { %p604_p9 = scmp.ne.s32.totalorder %s778_s7, %s603_s6  ;;  %p607_p10 = scmp.lt.u32.totalorder %s603_s6, %s778_s7 }
 0x2f0   :  { %p609_p11 = pnand %p607_p10, %p604_p9 }
 0x2f2   :  { %612 = shalt.err (!%p609_p11)
}
 0x2f3   :  { %378 = dma.vmem_to_hbm [thread:$0]  %s376_s29, 128, %s778_s7, [#allocation4]  }
 0x2f4   :  { %619 = dma.done.wait [#allocation4], 128  }
 0x2f5   :  { %620 = vsyncadd [#allocation4], 4294967168 }
 0x2f6   :  { %382 = vsyncpa [#allocation3], 1 }
 0x2f7   :  { %383 = vsyncpa [#allocation6], 1 }
 0x2f8   :  { %384 = vsyncpa [#allocation9], 1 }
 0x2f9   :  { %385 = vsyncpa [#allocation4], 1 }

</bundles_post_ra>
